<compile_context>
chip_gen: v5e
topology: v5e:2x2
jax: 0.10.0
libtpu: 0.0.40
codegen_flags: <defaults>
</compile_context>

<pallas_src>
import functools
import math

import jax
import jax.numpy as jnp
from jax.experimental import pallas as pl
from jax.experimental.pallas import tpu as pltpu


# ------------------------------ Pallas kernel ------------------------------ #

def _embedding_kernel(ids_ref, table_ref, o_ref, *, scale, precision):
    """One grid step: vectorized gather of a block of rows + sqrt(d_model) scale.

    ids_ref   : VMEM (rows_per_block, 1) int32     -- token ids for this block
    table_ref : VMEM (vocab, d_model)              -- resident across grid steps
    o_ref     : VMEM (rows_per_block, d_model)     -- lane-dense output tile
    """
    rows = ids_ref.shape[0]
    vocab = table_ref.shape[0]

    ids = ids_ref[...]                                            # (R, 1)
    iota = jax.lax.broadcasted_iota(jnp.int32, (rows, vocab), 1)  # (R, vocab)
    onehot = (iota == ids).astype(table_ref.dtype)                # exact 0/1

    gathered = jnp.dot(                                           # (R, d_model)
        onehot, table_ref[...],
        preferred_element_type=jnp.float32,
        precision=precision,
    )
    o_ref[...] = (gathered * scale).astype(o_ref.dtype)


# ------------------------------ wrapper ------------------------------------ #

def embedding_forward(table, ids, *, rows_per_block=None):
    """Pallas equivalent of `Embedding.forward`: table[ids] * sqrt(d_model)."""
    vocab, d_model = table.shape
    lead_shape = ids.shape

    # Clamp ids (PyTorch would raise on OOB; TPU VMEM is not bounds-checked, and
    # the one-hot gather would silently produce a zero row).  Clamping matches
    # jnp's own gather semantics for the reference computation.
    flat_ids = jnp.clip(ids.reshape(-1).astype(jnp.int32), 0, vocab - 1)
    n = flat_ids.shape[0]

    if rows_per_block is None:
        # ~n/8 grid blocks (megacore balance), capped at 512 rows and by a
        # ~2 MiB budget for the in-kernel one-hot intermediate; floor of one
        # sublane tile (8 rows).
        onehot_cap = max(8, ((2 << 20) // (vocab * 4)) // 8 * 8)
        rows_per_block = max(
            8, min(512, onehot_cap, pl.next_power_of_2(max(1, n // 8)))
        )

    n_pad = pl.cdiv(n, rows_per_block) * rows_per_block
    if n_pad != n:
        flat_ids = jnp.pad(flat_ids, (0, n_pad - n))
    ids2d = flat_ids.reshape(n_pad, 1)

    # Explicit VMEM budget: table (assume double-buffered, conservative) +
    # double-buffered ids/output blocks + one-hot intermediate + headroom.
    itemsize = jnp.dtype(table.dtype).itemsize
    table_bytes = vocab * d_model * itemsize
    out_block_bytes = rows_per_block * d_model * itemsize
    ids_block_bytes = rows_per_block * 128 * 4        # int32, lane-padded
    onehot_bytes = rows_per_block * vocab * 4
    vmem_budget = (2 * table_bytes + 2 * (out_block_bytes + ids_block_bytes)
                   + 2 * onehot_bytes + (4 << 20))
    vmem_limit = int(min(max(vmem_budget, 16 << 20), 64 << 20))

    # f32 table: highest matmul precision so the one-hot gather reproduces the
    # f32 row exactly (no bf16 truncation of the table operand).
    precision = (jax.lax.Precision.HIGHEST
                 if jnp.dtype(table.dtype) == jnp.float32 else None)

    kern = functools.partial(
        _embedding_kernel,
        scale=float(math.sqrt(d_model)),
        precision=precision,
    )

    out = pl.pallas_call(
        kern,
        out_shape=jax.ShapeDtypeStruct((n_pad, d_model), table.dtype),
        grid=(n_pad // rows_per_block,),
        in_specs=[
            # Per-block token ids, delivered as a VMEM vector block.
            pl.BlockSpec((rows_per_block, 1), lambda i: (i, 0)),
            # Whole 2-D embedding table, VMEM-resident (constant index map ->
            # DMA'd once, reused by every grid step).
            pl.BlockSpec((vocab, d_model), lambda i: (0, 0)),
        ],
        out_specs=pl.BlockSpec((rows_per_block, d_model), lambda i: (i, 0)),
        compiler_params=pltpu.CompilerParams(
            dimension_semantics=("parallel",),
            vmem_limit_bytes=vmem_limit,
        ),
    )(ids2d, table)

    return out[:n].reshape(*lead_shape, d_model)


# --------------------------------- main ------------------------------------- #

if __name__ == "__main__":
    vocab, d_model = 256, 128       # d_model = 128 -> lane-dense output tiles
    B, L = 2, 8

    root = jax.random.PRNGKey(0)
    k_table, k_ids = jax.random.split(root)

    table = 0.02 * jax.random.normal(k_table, (vocab, d_model), jnp.float32)
    ids = jax.random.randint(k_ids, (B, L), 0, vocab)

    out = embedding_forward(table, ids)
    jax.block_until_ready(out)

    # Reference: exact semantics of the PyTorch module.
    ref = table[ids] * math.sqrt(d_model)
    assert out.shape == (B, L, d_model)
    assert jnp.allclose(out, ref, rtol=5e-3, atol=1e-6), float(
        jnp.max(jnp.abs(out - ref)))

    print("KERNEL_OK")
</pallas_src>

<mosaic_0001>
module attributes {stable_mosaic.version = 11 : i64} {
  func.func @_embedding_kernel(%arg0: i32, %arg1: memref<8x1xi32, #tpu.memory_space<vmem>>, %arg2: memref<256x128xf32, #tpu.memory_space<vmem>>, %arg3: memref<8x128xf32, #tpu.memory_space<vmem>>) attributes {dimension_semantics = [#tpu.dimension_semantics<parallel>], iteration_bounds = array<i64: 2>, scalar_prefetch = 0 : i64, scratch_operands = 0 : i64, tpu.core_type = #tpu.core_type<tc>, window_params = [{transform_indices = @transform_0, window_bounds = array<i64: 8, 1>}, {pipeline_mode = #tpu.pipeline_mode<synchronous>, transform_indices = @transform_1, window_bounds = array<i64: 256, 128>}, {transform_indices = @transform_2, window_bounds = array<i64: 8, 128>}]} {
    %c0 = arith.constant 0 : index
    %c0_0 = arith.constant 0 : index
    %0 = vector.load %arg1[%c0, %c0_0] : memref<8x1xi32, #tpu.memory_space<vmem>>, vector<8x1xi32>
    %1 = tpu.iota {dimensions = array<i32: 1>} : vector<8x256xi32>
    %2 = vector.broadcast %0 : vector<8x1xi32> to vector<8x256xi32>
    %3 = arith.cmpi eq, %1, %2 : vector<8x256xi32>
    %4 = arith.extui %3 : vector<8x256xi1> to vector<8x256xi32>
    %5 = arith.sitofp %4 : vector<8x256xi32> to vector<8x256xf32>
    %c0_1 = arith.constant 0 : index
    %c0_2 = arith.constant 0 : index
    %6 = vector.load %arg2[%c0_1, %c0_2] : memref<256x128xf32, #tpu.memory_space<vmem>>, vector<256x128xf32>
    %cst = arith.constant dense<0.000000e+00> : vector<8x128xf32>
    %7 = tpu.matmul %5, %6, %cst {dimension_numbers = #tpu.dot_dimension_numbers<[1], [0], [0], [1], [0, 0, 1, 1], [], []>, precision = #tpu.contract_precision<fp32>} : vector<8x256xf32>, vector<256x128xf32>, vector<8x128xf32> -> vector<8x128xf32>
    %cst_3 = arith.constant 11.3137083 : f32
    %8 = vector.broadcast %cst_3 : f32 to vector<8x128xf32>
    %9 = arith.mulf %7, %8 : vector<8x128xf32>
    %c0_4 = arith.constant 0 : index
    %c0_5 = arith.constant 0 : index
    %10 = vector.load %arg3[%c0_4, %c0_5] : memref<8x128xf32, #tpu.memory_space<vmem>>, vector<8x128xf32>
    tpu.vector_store %arg3[%c0_4, %c0_5], %9 {strides = array<i32>} : memref<8x128xf32, #tpu.memory_space<vmem>>, vector<8x128xf32>,
    return
  }
  func.func @transform_0(%arg0: i32) -> (i32, i32) {
    %c0_i32 = arith.constant 0 : i32
    %c0_i32_0 = arith.constant 0 : i32
    return %arg0, %c0_i32 : i32, i32
  }
  func.func @transform_1(%arg0: i32) -> (i32, i32) {
    %c0_i32 = arith.constant 0 : i32
    %c0_i32_0 = arith.constant 0 : i32
    %c0_i32_1 = arith.constant 0 : i32
    return %c0_i32, %c0_i32_0 : i32, i32
  }
  func.func @transform_2(%arg0: i32) -> (i32, i32) {
    %c0_i32 = arith.constant 0 : i32
    %c0_i32_0 = arith.constant 0 : i32
    return %arg0, %c0_i32 : i32, i32
  }
}

</mosaic_0001>

<bundles_post_ra>
// kernel: tpu_custom_call.1
= control target key start
LH: loop header
LB: loop body
LE: loop exit
PB: predicated region body
PF: predicated region fallthrough
CT: control target
= control target key end

     0   :  { %7 = vsyncpa [#allocation3], 0  ;;  %s1784_s0 = inlined_call_operand.vmem [shape: s32[16,1], index: 0, kind: input, shape index: {}]   ;;  %s1785_s1 = inlined_call_operand.hbm [shape: f32[256,128], index: 1, kind: input, shape index: {}]   ;;  %s1786_s2 = inlined_call_operand.hbm [shape: f32[16,128], index: 2, kind: output, shape index: {}]  }
   0x1   :  { %8 = vsyncpa [#allocation4], 0 }
   0x2   :  { %10 = vsyncpa [#allocation4 + $0x1], 0  ;;  %s1167_s9 = smov 0   ;;  %s1169_s10 = smov 0  }
   0x3   :  { %s1171_s11 = smov 0   ;;  %s1173_s12 = smov 0  }
   0x4 LB: > { %s1188_s13 = sadd.s32 4294967295, %s1144_s12   ;;  %s972_s14 = sadd.s32 4294967294, %s1144_s12   ;;  %s1144_s12 = sphi %s1173_s12, %s1855_s12   ;;  %s1140_s11 = sphi %s1171_s11, %s1854_s11   ;;  %s1136_s10 = sphi %s1169_s10, %s1853_s10   ;;  %s1132_s9 = sphi %s1167_s9, %s1852_s9  }
   0x5   : > { %s1192_s15 = sadd.s32 1, %s1144_s12   ;;  %s70_s16 = sadd.s32 1, %s1140_s11 }
   0x6   : > { %s67_s17 = ssub.s32 %s1144_s12, %s1192_s15  ;;  %p80_p0 = scmp.ne.s32.totalorder %s1140_s11, %s1136_s10 }
   0x7   : > { %p68_p1 = scmp.eq.s32.totalorder %s67_s17, 0  ;;  %p81_p2 = scmp.eq.s32.totalorder %s1188_s13, 1 }
   0x8   : > { %p86_p3 = scmp.ne.s32.totalorder %s1136_s10, %s1132_s9  ;;  %p87_p4 = scmp.eq.s32.totalorder %s972_s14, 1 }
   0x9   : > { %s1203_s18 = scalar_select %p68_p1, %s1140_s11, %s70_s16  }
   0xa   : > { %p1205_p5 = por %p81_p2, %p80_p0  ;;  %p1209_p6 = por %p87_p4, %p86_p3 }
   0xb   : > { %p973_p7 = scmp.ge.s32.totalorder %s1144_s12, 1  ;;  %p94_p8 = scmp.lt.s32.totalorder %s1144_s12, 3 }
   0xc   : > { %p1006_p9 = scmp.eq.s32.totalorder %s1188_s13, 0  ;;  %s105_s23 = sshll.u32 %s1785_s1, 4  ;;  %s106_s23 = int_to_ptr.hbm [resolvable:$true] %s105_s23 }
   0xd   : > { %p95_p10 = pnand %p973_p7, %p94_p8  ;;  %s1146_s24 = smov [#allocation2]  }
   0xe   : > { %s107_s25 = sshll.u32 %s1146_s24, 4  ;;  %s1147_s26 = smov 128   ;;  %s108_s25 = int_to_ptr.vmem [resolvable:$true] %s107_s25 }
   0xf   : > { %p998_p11 = pneg %p95_p10  ;;  %s1148_s27 = smov 8  }
  0x10   : > { %130 = sbr.rel (%p95_p10) target bundleno = 327 (0x147), region = 28 }
  0x11   : > { %p999_p12 = pnand %p1006_p9, %p998_p11 }
  0x13   : > { %1001 = dma.hbm_to_vmem [thread:$0]  (!%p999_p12), %s106_s23, 4096, %s108_s25, [#allocation3], %s1147_s26, %s1147_s26, %s1148_s27  }
  0x15   : > { %1123 = dma.done.wait (%p1006_p9), [#allocation3], 4096  }
  0x16   : > { %1125 = vsyncadd (%p1006_p9), [#allocation3], 4294963200  ;;  %p152_p13 = scmp.lt.s32.totalorder %s1188_s13, 1  ;;  %v1149_v0 = vmov 0   ;;  %v184_v2 = vld [vmem:[#allocation2 + $0x78] sm:$0xff]  ;;  %v183_v3 = vld [vmem:[#allocation2 + $0x70] sm:$0xff] }
  0x17   : > { %1047 = vset.pattern.permute.xlu0 %v1149_v0  ;;  %v1230_v4 = vand.u32 4294901760, %v184_v2  ;;  %v1232_v5 = vand.u32 4294901760, %v183_v3  ;;  %v182_v6 = vld [vmem:[#allocation2 + $0x68] sm:$0xff]  ;;  %v181_v7 = vld [vmem:[#allocation2 + $0x60] sm:$0xff]  ;;  %v180_v8 = vld [vmem:[#allocation2 + $0x58] sm:$0xff]  ;;  %s149_s5 = sand.u32 1, %s1136_s10  }
  0x18   : > { %s153_s28 = scalar_select %p152_p13, %s1188_s13, 1  ;;  %v1234_v9 = vand.u32 4294901760, %v182_v6  ;;  %v1236_v10 = vand.u32 4294901760, %v181_v7  ;;  %v1238_v11 = vand.u32 4294901760, %v180_v8  ;;  %v179_v12 = vld [vmem:[#allocation2 + $0x50] sm:$0xff]  ;;  %v178_v13 = vld [vmem:[#allocation2 + $0x48] sm:$0xff] }
  0x19   : > { %v177_v14 = vld [vmem:[#allocation2 + $0x40] sm:$0xff]  ;;  %v1241_v15 = vsub.f32 %v184_v2, %v1230_v4  ;;  %v1244_v16 = vsub.f32 %v183_v3, %v1232_v5  ;;  %398 = vmatpush.msra.mxu3 %v1230_v4  ;;  %202 = vmatpush.msra.mxu0 %v1230_v4  ;;  %v1248_v17 = vand.u32 4294901760, %v179_v12  ;;  %v1250_v18 = vand.u32 4294901760, %v178_v13  ;;  %v176_v35 = vld [vmem:[#allocation2 + $0x38] sm:$0xff]  ;;  %v175_v36 = vld [vmem:[#allocation2 + $0x30] sm:$0xff]  ;;  %s978_s6 = sshll.u32 %s149_s5, 3 }
  0x1a   : > { %s979_s29 = sshll.u32 %s153_s28, 3  ;;  %v1253_v19 = vsub.f32 %v182_v6, %v1234_v9  ;;  %v1256_v20 = vsub.f32 %v181_v7, %v1236_v10  ;;  %v1259_v21 = vsub.f32 %v180_v8, %v1238_v11  ;;  %v1261_v22 = vand.u32 4294901760, %v177_v14  ;;  %v174_v40 = vld [vmem:[#allocation2 + $0x28] sm:$0xff]  ;;  %v173_v42 = vld [vmem:[#allocation2 + $0x20] sm:$0xff]  ;;  %v172_v47 = vld [vmem:[#allocation2 + $0x18] sm:$0xff]  ;;  %s989_s7 = sshll.u32 %s1188_s13, 3 }
  0x1b   : > { %s155_s4 = scalar_lea.vmem %s1784_s0, %s979_s29  ;;  %v1801_v23 = vand.u32 4294901760, %v1241_v15  ;;  %v1800_v24 = vand.u32 4294901760, %v1244_v16  ;;  %345 = vmatpush.msra.mxu2 %v1241_v15  ;;  %400 = vmatpush.msra.mxu3 %v1232_v5  ;;  %v1268_v25 = vsub.f32 %v179_v12, %v1248_v17  ;;  %v1274_v28 = vsub.f32 %v178_v13, %v1250_v18  ;;  %v171_v55 = vld [vmem:[#allocation2 + $0x10] sm:$0xff]  ;;  %v170_v61 = vld [vmem:[#allocation2 + $0x8] sm:$0xff]  ;;  %v169_v3 = vld [vmem:[#allocation2] sm:$0xff]  ;;  %s896_s16 = scalar_lea.hbm %s1786_s2, %s989_s7 }
  0x1c   : > { %v156_v1 = vld [vmem:[%s155_s4] sm:$0xff]  ;;  %v1799_v26 = vand.u32 4294901760, %v1253_v19  ;;  %v1796_v27 = vand.u32 4294901760, %v1256_v20  ;;  %204 = vmatpush.msra.mxu0 %v1232_v5  ;;  %v1795_v31 = vand.u32 4294901760, %v1259_v21  ;;  %v1291_v34 = vsub.f32 %v177_v14, %v1261_v22  ;;  %v200_v12 = vld [vmem:[#allocation2 + $0xf8] sm:$0xff]  ;;  %v199_v13 = vld [vmem:[#allocation2 + $0xf0] sm:$0xff] }
  0x1d   : > { %161 = vperm.xlu0 %1047, %v156_v1   ;;  %v245_v29 = vsub.f32 %v1241_v15, %v1801_v23  ;;  %v251_v30 = vsub.f32 %v1244_v16, %v1800_v24  ;;  %348 = vmatpush.msra.mxu2 %v1244_v16  ;;  %v1794_v33 = vand.u32 4294901760, %v1268_v25  ;;  %v1792_v41 = vand.u32 4294901760, %v1274_v28  ;;  %s151_s17 = scalar_lea.vmem [#allocation5], %s978_s6  ;;  %s900_s22 = sshll.u32 %s896_s16, 4  ;;  %s901_s22 = int_to_ptr.hbm [resolvable:$true] %s900_s22 }
  0x1e   : > { %402 = vmatpush.msra.mxu3 %v1234_v9  ;;  %v257_v32 = vsub.f32 %v1253_v19, %v1799_v26  ;;  %206 = vmatpush.msra.mxu0 %v1234_v9  ;;  %v263_v39 = vsub.f32 %v1256_v20, %v1796_v27  ;;  %v269_v44 = vsub.f32 %v1259_v21, %v1795_v31  ;;  %v1304_v45 = vand.u32 4294901760, %v176_v35  ;;  %s898_s21 = sshll.u32 %s151_s17, 4  ;;  %s886_s13 = scalar_lea.sflag [#allocation4], %s149_s5  ;;  %s899_s21 = int_to_ptr.vmem [resolvable:$true] %s898_s21 }
  0x1f   : > { %v246_v37 = vand.u32 4294901760, %v245_v29  ;;  %v252_v38 = vand.u32 4294901760, %v251_v30  ;;  %351 = vmatpush.msra.mxu2 %v1253_v19  ;;  %v1306_v46 = vand.u32 4294901760, %v175_v36  ;;  %v275_v48 = vsub.f32 %v1268_v25, %v1794_v33  ;;  %v198_v30 = vld [vmem:[#allocation2 + $0xe8] sm:$0xff]  ;;  %s1092_s23 = sshra.s32 %s901_s22, 4  ;;  %s1098_s27 = scalar_lea.hbm %s1786_s2, 16  ;;  %s1093_s23 = int_to_ptr.hbm [resolvable:$true] %s1092_s23 }
  0x20   : > { %404 = vmatpush.msra.mxu3 %v1236_v10  ;;  %208 = vmatpush.msra.mxu0 %v1236_v10  ;;  %v258_v43 = vand.u32 4294901760, %v257_v32  ;;  %v1791_v49 = vand.u32 4294901760, %v1291_v34  ;;  %v1314_v50 = vand.u32 4294901760, %v174_v40  ;;  %v264_v51 = vand.u32 4294901760, %v263_v39  ;;  %s1094_s24 = scalar_lea.hbm %s1093_s23, 8  ;;  %p1099_p3 = scmp.lt.s32.totalorder %s1093_s23, %s1786_s2 }
  0x21   : > { %247 = vmatpush.msra.mxu1 %v246_v37  ;;  %354 = vmatpush.msra.mxu2 %v1256_v20  ;;  %v1318_v52 = vsub.f32 %v176_v35, %v1304_v45  ;;  %v1321_v53 = vsub.f32 %v175_v36, %v1306_v46  ;;  %v1323_v54 = vand.u32 4294901760, %v173_v42  ;;  %v1330_v57 = vand.u32 4294901760, %v172_v47  ;;  %v197_v37 = vld [vmem:[#allocation2 + $0xe0] sm:$0xff]  ;;  %p1095_p0 = scmp.ne.s32.totalorder %s1093_s23, %s1094_s24  ;;  %p1100_p4 = scmp.lt.s32.totalorder %s1098_s27, %s1094_s24 }
  0x22   : > { %406 = vmatpush.msra.mxu3 %v1238_v11  ;;  %210 = vmatpush.msra.mxu0 %v1238_v11  ;;  %v1328_v56 = vsub.f32 %v174_v40, %v1314_v50  ;;  %v270_v58 = vand.u32 4294901760, %v269_v44  ;;  %v281_v59 = vsub.f32 %v1274_v28, %v1792_v41  ;;  %v287_v62 = vsub.f32 %v1291_v34, %v1791_v49 }
  0x23   : > { %253 = vmatpush.msra.mxu1 %v252_v38  ;;  %357 = vmatpush.msra.mxu2 %v1259_v21  ;;  %v1790_v60 = vand.u32 4294901760, %v1318_v52  ;;  %v1342_v63 = vand.u32 4294901760, %v171_v55  ;;  %v276_v0 = vand.u32 4294901760, %v275_v48  ;;  %v1788_v1 = vand.u32 4294901760, %v1321_v53  ;;  %p1096_p1 = pnand %p1095_p0, %p1205_p5  ;;  %p1101_p7 = por %p1100_p4, %p1099_p3 }
  0x24   : > { %408 = vmatpush.msra.mxu3 %v1248_v17  ;;  %212 = vmatpush.msra.mxu0 %v1248_v17  ;;  %v1347_v2 = vsub.f32 %v173_v42, %v1323_v54  ;;  %v1787_v6 = vand.u32 4294901760, %v1328_v56  ;;  %v1353_v7 = vsub.f32 %v172_v47, %v1330_v57  ;;  %v1355_v8 = vand.u32 4294901760, %v170_v61 }
  0x25   : > { %259 = vmatpush.msra.mxu1 %v258_v43  ;;  %360 = vmatpush.msra.mxu2 %v1268_v25  ;;  %v282_v14 = vand.u32 4294901760, %v281_v59  ;;  %v293_v29 = vsub.f32 %v1318_v52, %v1790_v60  ;;  %v288_v32 = vand.u32 4294901760, %v287_v62  ;;  %v1364_v35 = vsub.f32 %v171_v55, %v1342_v63  ;;  %v196_v43 = vld [vmem:[#allocation2 + $0xd8] sm:$0xff]  ;;  %p1097_p2 = pneg %p1096_p1 }
  0x26   : > { %410 = vmatpush.msra.mxu3 %v1250_v18  ;;  %214 = vmatpush.msra.mxu0 %v1250_v18  ;;  %v1366_v36 = vand.u32 4294901760, %v169_v3  ;;  %v299_v38 = vsub.f32 %v1321_v53, %v1788_v1  ;;  %v1789_v39 = vand.u32 4294901760, %v1347_v2  ;;  %v1373_v40 = vand.u32 4294901760, %v200_v12 }
  0x27   : > { %265 = vmatpush.msra.mxu1 %v264_v51  ;;  %363 = vmatpush.msra.mxu2 %v1274_v28  ;;  %v1375_v42 = vand.u32 4294901760, %v199_v13  ;;  %v305_v44 = vsub.f32 %v1328_v56, %v1787_v6  ;;  %v1793_v47 = vand.u32 4294901760, %v1353_v7  ;;  %v1384_v48 = vsub.f32 %v170_v61, %v1355_v8  ;;  %p1102_p8 = pnand %p1101_p7, %p1097_p2 }
  0x28   : > { %412 = vmatpush.msra.mxu3 %v1261_v22  ;;  %216 = vmatpush.msra.mxu0 %v1261_v22  ;;  %1817 = vst [vmem:[#allocation8_spill] sm:$0xff] %v1366_v36  ;;  %v1386_v51 = vand.u32 4294901760, %v198_v30  ;;  %v294_v55 = vand.u32 4294901760, %v293_v29  ;;  %v1395_v62 = vand.u32 4294901760, %v197_v37  ;;  %v1400_v61 = vsub.f32 %v169_v3, %v1366_v36 }
  0x29   : > { %271 = vmatpush.msra.mxu1 %v270_v58  ;;  %366 = vmatpush.msra.mxu2 %v1291_v34  ;;  %v1390_v58 = vsub.f32 %v200_v12, %v1373_v40  ;;  %v1393_v59 = vsub.f32 %v199_v13, %v1375_v42  ;;  %v1405_v29 = vand.u32 4294901760, %v196_v43  ;;  %v300_v12 = vand.u32 4294901760, %v299_v38 }
  0x2a   : > { %414 = vmatpush.msra.mxu3 %v1304_v45  ;;  %218 = vmatpush.msra.mxu0 %v1304_v45  ;;  %v311_v13 = vsub.f32 %v1347_v2, %v1789_v39  ;;  %v1798_v6 = vand.u32 4294901760, %v1364_v35  ;;  %v306_v38 = vand.u32 4294901760, %v305_v44  ;;  %v317_v39 = vsub.f32 %v1353_v7, %v1793_v47  ;;  %v193_v47 = vld [vmem:[#allocation2 + $0xc0] sm:$0xff] }
  0x2b   : > { %277 = vmatpush.msra.mxu1 %v276_v0  ;;  %369 = vmatpush.msra.mxu2 %v1318_v52  ;;  %1818 = vst [vmem:[#allocation9_spill] sm:$0xff] %v1390_v58  ;;  %v195_v0 = vld [vmem:[#allocation2 + $0xd0] sm:$0xff]  ;;  %v1797_v1 = vand.u32 4294901760, %v1390_v58  ;;  %v1802_v3 = vand.u32 4294901760, %v1393_v59  ;;  %v1803_v60 = vand.u32 4294901760, %v1384_v48  ;;  %v1424_v49 = vsub.f32 %v197_v37, %v1395_v62 }
  0x2c   : > { %416 = vmatpush.msra.mxu3 %v1306_v46  ;;  %220 = vmatpush.msra.mxu0 %v1306_v46  ;;  %1819 = vst [vmem:[#allocation10_spill] sm:$0xff] %v1393_v59  ;;  %v1433_v41 = vsub.f32 %v196_v43, %v1405_v29  ;;  %v312_v33 = vand.u32 4294901760, %v311_v13  ;;  %v323_v37 = vsub.f32 %v1364_v35, %v1798_v6  ;;  %v1807_v31 = vand.u32 4294901760, %v1400_v61  ;;  %v192_v13 = vld [vmem:[#allocation2 + $0xb8] sm:$0xff] }
  0x2d   : > { %283 = vmatpush.msra.mxu1 %v282_v14  ;;  %372 = vmatpush.msra.mxu2 %v1321_v53  ;;  %v1403_v14 = vsub.f32 %v198_v30, %v1386_v51  ;;  %v1416_v30 = vand.u32 4294901760, %v195_v0  ;;  %1821 = vst [vmem:[#allocation12_spill] sm:$0xff] %v1424_v49  ;;  %v592_v43 = vsub.f32 %v1393_v59, %v1802_v3  ;;  %v1455_v24 = vand.u32 4294901760, %v193_v47 }
  0x2e   : > { %418 = vmatpush.msra.mxu3 %v1314_v50  ;;  %222 = vmatpush.msra.mxu0 %v1314_v50  ;;  %v329_v6 = vsub.f32 %v1384_v48, %v1803_v60  ;;  %v324_v3 = vand.u32 4294901760, %v323_v37  ;;  %v335_v60 = vsub.f32 %v1400_v61, %v1807_v31  ;;  %v1822_v31 = vand.u32 4294901760, %v1424_v49 }
  0x2f   : > { %1820 = vst [vmem:[#allocation11_spill] sm:$0xff] %v1403_v14  ;;  %289 = vmatpush.msra.mxu1 %v288_v32  ;;  %375 = vmatpush.msra.mxu2 %v1328_v56  ;;  %v194_v32 = vld [vmem:[#allocation2 + $0xc8] sm:$0xff]  ;;  %v1806_v44 = vand.u32 4294901760, %v1403_v14  ;;  %v593_v59 = vand.u32 4294901760, %v592_v43 }
  0x30   : > { %420 = vmatpush.msra.mxu3 %v1323_v54  ;;  %224 = vmatpush.msra.mxu0 %v1323_v54  ;;  %v1440_v27 = vand.u32 4294901760, %v194_v32  ;;  %v330_v37 = vand.u32 4294901760, %v329_v6  ;;  %v189_v6 = vld [vmem:[#allocation2 + $0xa0] sm:$0xff] }
  0x31   : > { %295 = vmatpush.msra.mxu1 %v294_v55  ;;  %378 = vmatpush.msra.mxu2 %v1347_v2  ;;  %v586_v55 = vsub.f32 %v1390_v58, %v1797_v1  ;;  %v318_v1 = vand.u32 4294901760, %v317_v39  ;;  %v604_v39 = vsub.f32 %v1424_v49, %v1822_v31  ;;  %v336_v58 = vand.u32 4294901760, %v335_v60 }
  0x32   : > { %422 = vmatpush.msra.mxu3 %v1330_v57  ;;  %226 = vmatpush.msra.mxu0 %v1330_v57  ;;  %v1468_v26 = vsub.f32 %v194_v32, %v1440_v27  ;;  %v1480_v32 = vsub.f32 %v193_v47, %v1455_v24  ;;  %v1826_v60 = vand.u32 4294901760, %v1244_v16 }
  0x33   : > { %301 = vmatpush.msra.mxu1 %v300_v12  ;;  %381 = vmatpush.msra.mxu2 %v1353_v7  ;;  %v1448_v12 = vsub.f32 %v195_v0, %v1416_v30  ;;  %v587_v23 = vand.u32 4294901760, %v586_v55  ;;  %v598_v0 = vsub.f32 %v1403_v14, %v1806_v44  ;;  %v1470_v55 = vand.u32 4294901760, %v192_v13 }
  0x34   : > { %424 = vmatpush.msra.mxu3 %v1342_v63  ;;  %228 = vmatpush.msra.mxu0 %v1342_v63  ;;  %v1823_v44 = vand.u32 4294901760, %v1433_v41  ;;  %v621_v31 = vand.u32 4294901760, %v1468_v26 }
  0x35   : > { %307 = vmatpush.msra.mxu1 %v306_v38  ;;  %384 = vmatpush.msra.mxu2 %v1364_v35  ;;  %v191_v38 = vld [vmem:[#allocation2 + $0xb0] sm:$0xff]  ;;  %v599_v43 = vand.u32 4294901760, %v598_v0  ;;  %v1492_v47 = vsub.f32 %v192_v13, %v1470_v55  ;;  %v188_v0 = vld [vmem:[#allocation2 + $0x98] sm:$0xff]  ;;  %v1506_v13 = vand.u32 4294901760, %v189_v6 }
  0x36   : > { %426 = vmatpush.msra.mxu3 %v1355_v8  ;;  %230 = vmatpush.msra.mxu0 %v1355_v8  ;;  %v1482_v14 = vand.u32 4294901760, %v191_v38  ;;  %v622_v16 = vsub.f32 %v1468_v26, %v621_v31 }
  0x37   : > { %313 = vmatpush.msra.mxu1 %v312_v33  ;;  %387 = vmatpush.msra.mxu2 %v1384_v48  ;;  %v190_v33 = vld [vmem:[#allocation2 + $0xa8] sm:$0xff] }
  0x38   : > { %428 = vmatpush.msra.mxu3 %v1366_v36  ;;  %232 = vmatpush.msra.mxu0 %v1366_v36  ;;  %v1824_v36 = vand.u32 4294901760, %v1241_v15  ;;  %v1494_v49 = vand.u32 4294901760, %v190_v33  ;;  %v605_v15 = vand.u32 4294901760, %v604_v39  ;;  %v633_v39 = vand.u32 4294901760, %v1492_v47 }
  0x39   : > { %319 = vmatpush.msra.mxu1 %v318_v1  ;;  %390 = vmatpush.msra.mxu2 %v1400_v61  ;;  %v610_v1 = vsub.f32 %v1433_v41, %v1823_v44 }
  0x3a   : > { %588 = vmatpush.msrb.mxu3 %v587_v23  ;;  %439 = vmatpush.msrb.mxu0 %v1824_v36  ;;  %v1825_v23 = vand.u32 4294901760, %v1448_v12  ;;  %v627_v36 = vand.u32 4294901760, %v1480_v32 }
  0x3b   : > { %543 = vmatpush.msrb.mxu2 %v1373_v40  ;;  %325 = vmatpush.msra.mxu1 %v324_v3  ;;  %v1504_v3 = vsub.f32 %v191_v38, %v1482_v14  ;;  %v1518_v38 = vand.u32 4294901760, %v188_v0 }
  0x3c   : > { %594 = vmatpush.msrb.mxu3 %v593_v59  ;;  %v616_v44 = vsub.f32 %v1448_v12, %v1825_v23  ;;  %443 = vmatpush.msrb.mxu0 %v1826_v60  ;;  %v611_v59 = vand.u32 4294901760, %v610_v1  ;;  %v1827_v23 = vand.u32 4294901760, %v1253_v19 }
  0x3d   : > { %545 = vmatpush.msrb.mxu2 %v1375_v42  ;;  %331 = vmatpush.msra.mxu1 %v330_v37  ;;  %v1516_v37 = vsub.f32 %v190_v33, %v1494_v49  ;;  %v639_v1 = vand.u32 4294901760, %v1504_v3  ;;  %v1529_v33 = vsub.f32 %v189_v6, %v1506_v13 }
  0x3e   : > { %600 = vmatpush.msrb.mxu3 %v599_v43  ;;  %447 = vmatpush.msrb.mxu0 %v1827_v23  ;;  %v617_v19 = vand.u32 4294901760, %v616_v44  ;;  %v628_v43 = vsub.f32 %v1480_v32, %v627_v36  ;;  %v634_v44 = vsub.f32 %v1492_v47, %v633_v39 }
  0x3f   : > { %547 = vmatpush.msrb.mxu2 %v1386_v51  ;;  %337 = vmatpush.msra.mxu1 %v336_v58  ;;  %v1828_v58 = vand.u32 4294901760, %v1256_v20  ;;  %v623_v20 = vand.u32 4294901760, %v622_v16  ;;  %v645_v60 = vand.u32 4294901760, %v1516_v37  ;;  %v640_v6 = vsub.f32 %v1504_v3, %v639_v1 }
  0x40   : > { %606 = vmatpush.msrb.mxu3 %v605_v15  ;;  %v1540_v15 = vsub.f32 %v188_v0, %v1518_v38  ;;  %v635_v0 = vand.u32 4294901760, %v634_v44 }
  0x41   : > { %506 = vmatpush.msrb.mxu1 %v1230_v4  ;;  %549 = vmatpush.msrb.mxu2 %v1395_v62  ;;  %v1829_v4 = vand.u32 4294901760, %v1259_v21  ;;  %v629_v21 = vand.u32 4294901760, %v628_v43  ;;  %v641_v16 = vand.u32 4294901760, %v640_v6  ;;  %v187_v43 = vld [vmem:[#allocation2 + $0x90] sm:$0xff] }
  0x42   : > { %451 = vmatpush.msrb.mxu0 %v1828_v58  ;;  %612 = vmatpush.msrb.mxu3 %v611_v59  ;;  %v651_v59 = vand.u32 4294901760, %v1529_v33  ;;  %v657_v23 = vand.u32 4294901760, %v1540_v15  ;;  %v1833_v58 = vand.u32 4294901760, %v1318_v52  ;;  %v1835_v52 = vand.u32 4294901760, %v1328_v56 }
  0x43   : > { %508 = vmatpush.msrb.mxu1 %v1232_v5  ;;  %551 = vmatpush.msrb.mxu2 %v1405_v29  ;;  %v1830_v5 = vand.u32 4294901760, %v1268_v25  ;;  %v646_v25 = vsub.f32 %v1516_v37, %v645_v60  ;;  %v1839_v56 = vand.u32 4294901760, %v1384_v48 }
  0x44   : > { %455 = vmatpush.msrb.mxu0 %v1829_v4  ;;  %618 = vmatpush.msrb.mxu3 %v617_v19  ;;  %v658_v19 = vsub.f32 %v1540_v15, %v657_v23 }
  0x45   : > { %510 = vmatpush.msrb.mxu1 %v1234_v9  ;;  %553 = vmatpush.msrb.mxu2 %v1416_v30  ;;  %v1831_v9 = vand.u32 4294901760, %v1274_v28  ;;  %v652_v28 = vsub.f32 %v1529_v33, %v651_v59 }
  0x46   : > { %459 = vmatpush.msrb.mxu0 %v1830_v5  ;;  %624 = vmatpush.msrb.mxu3 %v623_v20  ;;  %v659_v4 = vand.u32 4294901760, %v658_v19  ;;  %v1151_v19 = vmov 1.0  }
  0x47   : > { %512 = vmatpush.msrb.mxu1 %v1236_v10  ;;  %555 = vmatpush.msrb.mxu2 %v1440_v27  ;;  %v1832_v10 = vand.u32 4294901760, %v1291_v34  ;;  %v1834_v34 = vand.u32 4294901760, %v1321_v53  ;;  %v1837_v53 = vand.u32 4294901760, %v1353_v7 }
  0x48   : > { %463 = vmatpush.msrb.mxu0 %v1831_v9  ;;  %630 = vmatpush.msrb.mxu3 %v629_v21 }
  0x49   : > { %514 = vmatpush.msrb.mxu1 %v1238_v11  ;;  %557 = vmatpush.msrb.mxu2 %v1455_v24  ;;  %v647_v11 = vand.u32 4294901760, %v646_v25  ;;  %v157_v25 = vlaneseq }
  0x4a   : > { %467 = vmatpush.msrb.mxu0 %v1832_v10  ;;  %636 = vmatpush.msrb.mxu3 %v635_v0 }
  0x4b   : > { %516 = vmatpush.msrb.mxu1 %v1248_v17  ;;  %559 = vmatpush.msrb.mxu2 %v1470_v55  ;;  %v653_v17 = vand.u32 4294901760, %v652_v28  ;;  %v158_v10 = vand.u32 127, %v157_v25 }
  0x4c   : > { %471 = vmatpush.msrb.mxu0 %v1833_v58  ;;  %642 = vmatpush.msrb.mxu3 %v641_v16  ;;  %v1150_v58 = vmov 0.0  }
  0x4d   : > { %518 = vmatpush.msrb.mxu1 %v1250_v18  ;;  %561 = vmatpush.msrb.mxu2 %v1482_v14  ;;  %v1836_v18 = vand.u32 4294901760, %v1347_v2  ;;  %v186_v2 = vld [vmem:[#allocation2 + $0x88] sm:$0xff]  ;;  %v1630_v16 = vadd.s32 128, %v158_v10 }
  0x4e   : > { %475 = vmatpush.msrb.mxu0 %v1834_v34  ;;  %648 = vmatpush.msrb.mxu3 %v647_v11  ;;  %v1603_v7 = vand.u32 4294901760, %v186_v2 }
  0x4f   : > { %520 = vmatpush.msrb.mxu1 %v1261_v22  ;;  %563 = vmatpush.msrb.mxu2 %v1494_v49  ;;  %v1586_v22 = vand.u32 4294901760, %v187_v43 }
  0x50   : > { %479 = vmatpush.msrb.mxu0 %v1835_v52  ;;  %654 = vmatpush.msrb.mxu3 %v653_v17 }
  0x51   : > { %522 = vmatpush.msrb.mxu1 %v1304_v45  ;;  %565 = vmatpush.msrb.mxu2 %v1506_v13  ;;  %v1838_v45 = vand.u32 4294901760, %v1364_v35  ;;  %v1606_v35 = vsub.f32 %v187_v43, %v1586_v22 }
  0x52   : > { %483 = vmatpush.msrb.mxu0 %v1836_v18  ;;  %660 = vmatpush.msrb.mxu3 %v659_v4  ;;  %v1842_v18 = vld [vmem:[#allocation9_spill] sm:$0xff] }
  0x53   : > { %524 = vmatpush.msrb.mxu1 %v1306_v46  ;;  %567 = vmatpush.msrb.mxu2 %v1518_v38  ;;  %v1840_v46 = vand.u32 4294901760, %v1400_v61  ;;  %v1613_v61 = vsub.f32 %v186_v2, %v1603_v7 }
  0x54   : > { %487 = vmatpush.msrb.mxu0 %v1837_v53  ;;  %v1843_v53 = vand.u32 4294901760, %v1842_v18 }
  0x55   : > { %526 = vmatpush.msrb.mxu1 %v1314_v50  ;;  %569 = vmatpush.msrb.mxu2 %v1586_v22  ;;  %v1841_v50 = vld [vmem:[#allocation8_spill] sm:$0xff] }
  0x56   : > { %491 = vmatpush.msrb.mxu0 %v1838_v45 }
  0x57   : > { %528 = vmatpush.msrb.mxu1 %v1323_v54  ;;  %571 = vmatpush.msrb.mxu2 %v1603_v7  ;;  %v663_v54 = vand.u32 4294901760, %v1606_v35 }
  0x58   : > { %495 = vmatpush.msrb.mxu0 %v1839_v56  ;;  %v1844_v56 = vld [vmem:[#allocation10_spill] sm:$0xff] }
  0x59   : > { %530 = vmatpush.msrb.mxu1 %v1330_v57  ;;  %v185_v57 = vld [vmem:[#allocation2 + $0x80] sm:$0xff] }
  0x5a   : > { %499 = vmatpush.msrb.mxu0 %v1840_v46  ;;  %v1610_v48 = vand.u32 4294901760, %v185_v57  ;;  %v1845_v46 = vand.u32 4294901760, %v1844_v56 }
  0x5b   : > { %532 = vmatpush.msrb.mxu1 %v1342_v63  ;;  %v664_v63 = vsub.f32 %v1606_v35, %v663_v54 }
  0x5c   : > { %573 = vmatpush.msrb.mxu2 %v1610_v48  ;;  %v1621_v20 = vsub.f32 %v185_v57, %v1610_v48  ;;  %v1846_v57 = vld [vmem:[#allocation11_spill] sm:$0xff] }
  0x5d   : > { %534 = vmatpush.msrb.mxu1 %v1355_v8  ;;  %v669_v8 = vand.u32 4294901760, %v1613_v61  ;;  %v665_v44 = vand.u32 4294901760, %v664_v63  ;;  %v1847_v63 = vand.u32 4294901760, %v1846_v57 }
  0x5e   : > { %v675_v21 = vand.u32 4294901760, %v1621_v20 }
  0x5f   : > { %536 = vmatpush.msrb.mxu1 %v1841_v50  ;;  %v670_v5 = vsub.f32 %v1613_v61, %v669_v8  ;;  %666 = vmatpush.msrb.mxu3 %v665_v44  ;;  %v1848_v44 = vld [vmem:[#allocation12_spill] sm:$0xff] }
  0x60   : > { %v676_v9 = vsub.f32 %v1621_v20, %v675_v21 }
  0x61   : > { %v671_v6 = vand.u32 4294901760, %v670_v5  ;;  %v1849_v5 = vand.u32 4294901760, %v1848_v44 }
  0x62   : > { %v677_v0 = vand.u32 4294901760, %v676_v9 }
  0x63   : > { %672 = vmatpush.msrb.mxu3 %v671_v6 }
  0x65   : > { %678 = vmatpush.msrb.mxu3 %v677_v0 }
  0x8f   : > { %v1632_v28 = vpop.permute.xlu0 %161 }
  0x90   : > { %vm163_vm0 = vcmp.eq.s32.totalorder %v158_v10, %v1632_v28  ;;  %vm164_vm1 = vcmp.eq.s32.totalorder %v1630_v16, %v1632_v28 }
  0x91   : > { %v981_v11 = vsel %vm164_vm1, 1.0, %v1150_v58  ;;  %982 = vmatmul.msk.f32.vlgmr.msra.gmra.mxu1 %vm163_vm0, %v1151_v19  ;;  %v980_v34 = vsel %vm163_vm0, 1.0, %v1150_v58 }
  0x92   : > { %v1645_v17 = vsub.f32 %v981_v11, %v981_v11  ;;  %739 = vmatpush.msra.mxu1 %v1373_v40  ;;  %v234_v52 = vsub.f32 %v980_v34, %v980_v34 }
  0x94   : > { %741 = vmatpush.msra.mxu1 %v1375_v42  ;;  %393 = vmatmul.f32.vlgmr.msra.gmra.mxu2 %v234_v52  ;;  %v235_v43 = vand.u32 4294901760, %v234_v52  ;;  %v576_v4 = vand.u32 4294901760, %v1645_v17 }
  0x95   : > { %780 = vmatpush.msra.mxu2 %v1843_v53 }
  0x96   : > { %743 = vmatpush.msra.mxu1 %v1386_v51  ;;  %432 = vmatmul.f32.vlgmr.msra.gmra.mxu3 %v235_v43  ;;  %v236_v45 = vsub.f32 %v234_v52, %v235_v43  ;;  %v577_v50 = vsub.f32 %v1645_v17, %v576_v4 }
  0x97   : > { %784 = vmatpush.msra.mxu2 %v1845_v46  ;;  %847 = vmatpush.msra.mxu3 %v1373_v40 }
  0x98   : > { %745 = vmatpush.msra.mxu1 %v1395_v62  ;;  %v237_v2 = vand.u32 4294901760, %v236_v45  ;;  %v578_v40 = vand.u32 4294901760, %v577_v50 }
  0x99   : > { %788 = vmatpush.msra.mxu2 %v1847_v63  ;;  %849 = vmatpush.msra.mxu3 %v1375_v42  ;;  %v1850_v42 = vand.u32 4294901760, %v1433_v41 }
  0x9a   : > { %984 = vmatmul.msk.f32.vlgmr.msrb.gmra.mxu1 %vm163_vm0, %v1151_v19  ;;  %238 = vmatmul.f32.vlgmr.msra.gmra.mxu0 %v237_v2 }
  0x9b   : > { %747 = vmatpush.msra.mxu1 %v1405_v29  ;;  %686 = vmatpush.msra.mxu0 %v1842_v18 }
  0x9c   : > { %792 = vmatpush.msra.mxu2 %v1849_v5  ;;  %851 = vmatpush.msra.mxu3 %v1386_v51  ;;  %v1851_v51 = vand.u32 4294901760, %v1448_v12 }
  0x9d   : > { %749 = vmatpush.msra.mxu1 %v1416_v30  ;;  %579 = vmatmul.f32.vlgmr.msrb.gmra.mxu2 %v578_v40 }
  0x9e   : > { %689 = vmatpush.msra.mxu0 %v1844_v56  ;;  %796 = vmatpush.msra.mxu2 %v1850_v42 }
  0x9f   : > { %853 = vmatpush.msra.mxu3 %v1395_v62  ;;  %751 = vmatpush.msra.mxu1 %v1440_v27 }
  0xa0   : > { %985 = vmatmul.msk.f32.vlgmr.msrb.gmra.mxu3 %vm164_vm1, %v1151_v19  ;;  %692 = vmatpush.msra.mxu0 %v1846_v57 }
  0xa1   : > { %800 = vmatpush.msra.mxu2 %v1851_v51  ;;  %855 = vmatpush.msra.mxu3 %v1405_v29 }
  0xa2   : > { %753 = vmatpush.msra.mxu1 %v1455_v24  ;;  %695 = vmatpush.msra.mxu0 %v1848_v44 }
  0xa3   : > { %804 = vmatpush.msra.mxu2 %v621_v31  ;;  %857 = vmatpush.msra.mxu3 %v1416_v30 }
  0xa4   : > { %755 = vmatpush.msra.mxu1 %v1470_v55  ;;  %983 = vmatmul.msk.f32.vlgmr.msrb.gmra.mxu0 %vm163_vm0, %v1151_v19 }
  0xa5   : > { %698 = vmatpush.msra.mxu0 %v1433_v41  ;;  %808 = vmatpush.msra.mxu2 %v627_v36 }
  0xa6   : > { %859 = vmatpush.msra.mxu3 %v1440_v27  ;;  %757 = vmatpush.msra.mxu1 %v1482_v14 }
  0xa7   : > { %701 = vmatpush.msra.mxu0 %v1448_v12  ;;  %812 = vmatpush.msra.mxu2 %v633_v39 }
  0xa8   : > { %861 = vmatpush.msra.mxu3 %v1455_v24  ;;  %759 = vmatpush.msra.mxu1 %v1494_v49 }
  0xa9   : > { %704 = vmatpush.msra.mxu0 %v1468_v26  ;;  %816 = vmatpush.msra.mxu2 %v639_v1 }
  0xaa   : > { %863 = vmatpush.msra.mxu3 %v1470_v55  ;;  %761 = vmatpush.msra.mxu1 %v1506_v13 }
  0xab   : > { %707 = vmatpush.msra.mxu0 %v1480_v32  ;;  %820 = vmatpush.msra.mxu2 %v645_v60 }
  0xac   : > { %865 = vmatpush.msra.mxu3 %v1482_v14  ;;  %763 = vmatpush.msra.mxu1 %v1518_v38 }
  0xad   : > { %710 = vmatpush.msra.mxu0 %v1492_v47  ;;  %824 = vmatpush.msra.mxu2 %v651_v59 }
  0xae   : > { %867 = vmatpush.msra.mxu3 %v1494_v49  ;;  %765 = vmatpush.msra.mxu1 %v1586_v22 }
  0xaf   : > { %713 = vmatpush.msra.mxu0 %v1504_v3  ;;  %828 = vmatpush.msra.mxu2 %v657_v23 }
  0xb0   : > { %869 = vmatpush.msra.mxu3 %v1506_v13  ;;  %767 = vmatpush.msra.mxu1 %v1603_v7 }
  0xb1   : > { %716 = vmatpush.msra.mxu0 %v1516_v37  ;;  %832 = vmatpush.msra.mxu2 %v663_v54 }
  0xb2   : > { %871 = vmatpush.msra.mxu3 %v1518_v38  ;;  %769 = vmatpush.msra.mxu1 %v1610_v48 }
  0xb3   : > { %719 = vmatpush.msra.mxu0 %v1529_v33  ;;  %773 = vmatmul.f32.vlgmr.msra.gmra.mxu1 %v576_v4 }
  0xb4   : > { %836 = vmatpush.msra.mxu2 %v669_v8  ;;  %873 = vmatpush.msra.mxu3 %v1586_v22 }
  0xb5   : > { %722 = vmatpush.msra.mxu0 %v1540_v15 }
  0xb6   : > { %840 = vmatpush.msra.mxu2 %v675_v21  ;;  %875 = vmatpush.msra.mxu3 %v1603_v7 }
  0xb7   : > { %986 = vmatmul.msk.f32.vlgmr.msra.gmra.mxu2 %vm164_vm1, %v1151_v19  ;;  %725 = vmatpush.msra.mxu0 %v1606_v35 }
  0xb8   : > { %877 = vmatpush.msra.mxu3 %v1610_v48 }
  0xb9   : > { %987 = vmatmul.msk.f32.vlgmr.msra.gmra.mxu3 %vm164_vm1, %v1151_v19  ;;  %728 = vmatpush.msra.mxu0 %v1613_v61 }
  0xbb   : > { %731 = vmatpush.msra.mxu0 %v1621_v20 }
  0xbc   : > { %734 = vmatmul.f32.vlgmr.msra.gmra.mxu0 %v1645_v17 }
 0x10e   : > { %v340_v26 = vpop.f32.mrf.mxu1 }
 0x117   : > { %v239_v24 = vpop.f32.mrf.mxu0  ;;  %v394_v41 = vpop.f32.mrf.mxu2 }
 0x118   : > { %v341_v27 = vadd.f32 %v340_v26, %v239_v24  ;;  %v539_v12 = vpop.f32.mrf.mxu1 }
 0x119   : > { %v433_v62 = vpop.f32.mrf.mxu3 }
 0x11a   : > { %v395_v49 = vadd.f32 %v394_v41, %v341_v27 }
 0x11c   : > { %v434_v29 = vadd.f32 %v433_v62, %v395_v49 }
 0x120   : > { %v580_v32 = vpop.f32.mrf.mxu2 }
 0x121   : > { %v502_v14 = vpop.f32.mrf.mxu0 }
 0x122   : > { %v503_v30 = vadd.f32 %v502_v14, %v434_v29 }
 0x123   : > { %v681_v47 = vpop.f32.mrf.mxu3 }
 0x124   : > { %v540_v55 = vadd.f32 %v539_v12, %v503_v30 }
 0x126   : > { %v581_v31 = vadd.f32 %v580_v32, %v540_v55 }
 0x128   : > { %v682_v36 = vadd.f32 %v681_v47, %v581_v31 }
 0x130   : > { %v774_v39 = vpop.f32.mrf.mxu1 }
 0x139   : > { %v735_v3 = vpop.f32.mrf.mxu0 }
 0x13a   : > { %v736_v13 = vadd.f32 %v735_v3, %v682_v36  ;;  %v843_v38 = vpop.f32.mrf.mxu2 }
 0x13c   : > { %v775_v37 = vadd.f32 %v774_v39, %v736_v13  ;;  %v880_v33 = vpop.f32.mrf.mxu3 }
 0x13e   : > { %v844_v1 = vadd.f32 %v843_v38, %v775_v37 }
 0x140   : > { %v881_v60 = vadd.f32 %v880_v33, %v844_v1 }
 0x142   : > { %v883_v15 = vmul.f32 11.313708, %v881_v60 }
 0x144   : > { %884 = vst [vmem:[%s151_s17] sm:$0xff] %v883_v15 }
 0x145   : > { %1105 = shalt.err (!%p1102_p8)
}
 0x146   : > { %996 = dma.vmem_to_hbm [thread:$0]  (%p1205_p5), %s899_s21, 128, %s901_s22, %s886_s13  }
 0x147 PF: > { %p1008_p9 = scmp.ge.s32.totalorder %s1144_s12, 2  ;;  %s912_s30 = sand.u32 1, %s1132_s9  }
 0x148   : > { %s913_s3 = scalar_lea.sflag [#allocation4], %s912_s30 }
 0x149   : > { %p1003_p10 = pnand %p1008_p9, %p1209_p6 }
 0x14b   : > { %p1004_p11 = pneg %p1003_p10 }
 0x14d   : > { %1127 = dma.done.wait (%p1004_p11), %s913_s3, 128  }
 0x14e   : > { %1129 = vsyncadd (%p1004_p11), %s913_s3, 4294967168  ;;  %p13_p12 = scmp.ge.s32.totalorder %s1192_s15, 4   ;;  %s1852_s9 = smov %s1136_s10 }
 0x14f   : > { %s1853_s10 = smov %s1140_s11  ;;  %s1854_s11 = smov %s1203_s18 }
 0x150   : > { %s1855_s12 = smov %s1192_s15  ;;  %15 = sbr.rel (!%p13_p12) target bundleno = 4 (0x4), region = 68 }
 0x155   :  { %919 = vsyncpa [#allocation3], 1 }
 0x156   :  { %921 = vsyncpa [#allocation3 + $0x1], 1 }
 0x157   :  { %922 = vsyncpa [#allocation4], 1 }
 0x158   :  { %924 = vsyncpa [#allocation4 + $0x1], 1 }

</bundles_post_ra>
